<compile_context>
chip_gen: v6e
topology: v6e:2x2x1
jax: 0.10.0
libtpu: 0.0.40
codegen_flags: <defaults>
</compile_context>

<pallas_src>
import jax
import jax.numpy as jnp
from jax.experimental import pallas as pl
from jax.experimental.pallas import tpu as pltpu


def _round_up(x, m):
    return ((x + m - 1) // m) * m


def _pick_tn(dt, tn_max):
    """Largest multiple of 128 that divides dt and is <= tn_max.
    If dt itself is small, use dt.  If no 128-multiple divisor exists, use a
    fixed 128-multiple tile and let the ragged last grid block be masked."""
    if dt <= tn_max:
        return dt
    cap = tn_max - (tn_max % 128)
    for t in range(cap, 127, -128):
        if dt % t == 0:
            return t
    return max(cap, 128)


# --------------------------------------------------------------------------
# Kernel 1: connector — grid=(L, Dt/tn); per step a plain 2-D GEMM on the MXU.
#   x:  (Bp, Dv)  bf16   CLS tokens for layer l (batch padded to 16)
#   w:  (Dv, tn)  bf16   tile of conn_w[l]
#   b:  (1,  tn)  f32
#   o:  (Bp, tn)  bf16   (f32 accumulate in-kernel, cast on store)
# --------------------------------------------------------------------------
def _connector_kernel(x_ref, w_ref, b_ref, o_ref):
    y = jnp.dot(x_ref[...], w_ref[...],
                preferred_element_type=jnp.float32) + b_ref[...]
    o_ref[...] = y.astype(o_ref.dtype)


def apply_connectors(cls_feats, w, b, *, tn_max=1024):
    """cls_feats: (L, B, Dv); w: (L, Dv, Dt) bf16; b: (L, Dt) f32 -> (L, B, Dt) bf16.

    tn_max=1024 keeps the per-step weight block <= ~2 MiB bf16 at Dv~1024, well
    inside the scoped-VMEM defaults (16 MiB v5e, 32 MiB v6e/v7x) even when
    double-buffered, while each weight DMA stays >= ~2 MiB (near HBM roofline).
    """
    L, B, Dv = cls_feats.shape
    Dt = w.shape[-1]
    Bp = _round_up(max(B, 16), 16)          # full bf16 sublane pack -> unmasked vld/vst
    x = cls_feats.astype(jnp.bfloat16)
    if Bp != B:
        x = jnp.pad(x, ((0, 0), (0, Bp - B), (0, 0)))

    tn = _pick_tn(Dt, tn_max)
    nt = pl.cdiv(Dt, tn)

    # Advisory cost: this call is HBM-bandwidth bound on the conn_w stream.
    cost = pl.CostEstimate(
        flops=2 * L * Bp * Dv * Dt,
        transcendentals=0,
        bytes_accessed=(L * Bp * Dv * 2) + (L * Dv * Dt * 2)
                       + (L * Dt * 4) + (L * Bp * Dt * 2),
    )

    # TODO(synk): optional further win — stream conn_w quantized (int8 on
    # v5e/v6e, fp8 on v7x) with per-layer scales and dequant in-kernel.
    out = pl.pallas_call(
        _connector_kernel,
        out_shape=jax.ShapeDtypeStruct((L, Bp, Dt), jnp.bfloat16),
        grid=(L, nt),
        in_specs=[
            pl.BlockSpec((None, Bp, Dv), lambda l, j: (l, 0, 0)),
            pl.BlockSpec((None, Dv, tn), lambda l, j: (l, 0, j)),
            pl.BlockSpec((1, tn), lambda l, j: (l, j)),
        ],
        out_specs=pl.BlockSpec((None, Bp, tn), lambda l, j: (l, 0, j)),
        compiler_params=pltpu.CompilerParams(
            dimension_semantics=("parallel", "parallel")),
        cost_estimate=cost,
    )(x, w, b)
    return out[:, :B, :]


# --------------------------------------------------------------------------
# Kernel 2: InputPrompts MLP  (Embedding(arange) -> Linear -> Tanh -> Linear)
#   e:  (Pp, prompt_dim)  bf16  (table rows, padded to a multiple of 16)
#   w1: (prompt_dim, mid_dim) bf16,  b1: (1, mid_dim) f32
#   w2: (mid_dim, prompt_dim) bf16,  b2: (1, prompt_dim) f32
#   o:  (Pp, prompt_dim)  f32
# --------------------------------------------------------------------------
def _prompt_mlp_kernel(e_ref, w1_ref, b1_ref, w2_ref, b2_ref, o_ref):
    h = jnp.dot(e_ref[...], w1_ref[...],
                preferred_element_type=jnp.float32) + b1_ref[...]
    h = jnp.tanh(h)
    y = jnp.dot(h.astype(w2_ref.dtype), w2_ref[...],
                preferred_element_type=jnp.float32) + b2_ref[...]
    o_ref[...] = y.astype(o_ref.dtype)


def precompute_prompt(params):
    """InputPrompts.get_prompt MLP. Batch/input invariant -> run ONCE at
    parameter-load time, not inside the per-batch forward.

    TODO(synk): at large OPT widths (prompt_dim=mid_dim>=2560) tile mid_dim or
    set vmem_limit_bytes for v5e's 16 MiB scoped default; load-time only.
    """
    emb = params["prompt_emb"]
    w1, b1 = params["prompt_w1"], params["prompt_b1"]
    w2, b2 = params["prompt_w2"], params["prompt_b2"]
    P, D = emb.shape
    M = w1.shape[-1]
    Pp = _round_up(max(P, 16), 16)           # full bf16 sublane pack
    e = emb.astype(jnp.bfloat16)
    if Pp != P:
        e = jnp.pad(e, ((0, Pp - P), (0, 0)))
    out = pl.pallas_call(
        _prompt_mlp_kernel,
        out_shape=jax.ShapeDtypeStruct((Pp, D), jnp.float32),
        grid=(1,),
        in_specs=[
            pl.BlockSpec((Pp, D), lambda i: (0, 0)),
            pl.BlockSpec((D, M), lambda i: (0, 0)),
            pl.BlockSpec((1, M), lambda i: (0, 0)),
            pl.BlockSpec((M, D), lambda i: (0, 0)),
            pl.BlockSpec((1, D), lambda i: (0, 0)),
        ],
        out_specs=pl.BlockSpec((Pp, D), lambda i: (0, 0)),
    )(e, w1, b1, w2, b2)
    return out[:P]


# --------------------------------------------------------------------------
# Glue: ePALM forward (connector + prompt-tuning paths)
# --------------------------------------------------------------------------
def epalm_forward(image_hidden_states, params, prompt_cache,
                  injected_hidden_states, bsz):
    """image_hidden_states: list of [B, S_vis, vis_dim] vision hidden states
    (stand-ins for `self.model_vision(image)` outputs).

    Returns (image_feat, prompts):
      image_feat: list (len = injected_hidden_states) of [B, 1, text_dim] bf16
      prompts:    [bsz, prompt_len, prompt_dim] f32
    """
    # TODO(synk): vision backbone (ViT/TimeSformer/AST) not translated; hidden
    # states are taken as inputs.
    feats = image_hidden_states[-injected_hidden_states:]
    # PyTorch pairs connector[-i] with feats[-i] => same-index pairing here.
    cls = jnp.stack([f[:, 0, :] for f in feats], axis=0)          # (L, B, vis_dim)
    projected = apply_connectors(cls, params["conn_w"], params["conn_b"])
    image_feat = [projected[i][:, None, :] for i in range(injected_hidden_states)]

    # Prompt is batch-invariant; just broadcast the precomputed table.
    prompts = jnp.broadcast_to(prompt_cache[None], (bsz,) + prompt_cache.shape)

    # TODO(synk): OPT decoder forward / generate (pretrained facebook/opt-*) not translated.
    return image_feat, prompts


# --------------------------------------------------------------------------
# Deterministic parameter init + example run
# --------------------------------------------------------------------------
def init_params(key, *, L, vis_dim, text_dim, p_len, prompt_dim, mid_dim):
    ks = jax.random.split(key, 6)
    s = 0.02
    return {
        # Weights stored/streamed in bf16 (HBM-BW bound path); f32 accumulate in-kernel.
        "conn_w": (s * jax.random.normal(ks[0], (L, vis_dim, text_dim), jnp.float32)
                   ).astype(jnp.bfloat16),
        "conn_b": s * jax.random.normal(ks[1], (L, text_dim), jnp.float32),
        "prompt_emb": s * jax.random.normal(ks[2], (p_len, prompt_dim), jnp.float32),
        "prompt_w1": (s * jax.random.normal(ks[3], (prompt_dim, mid_dim), jnp.float32)
                      ).astype(jnp.bfloat16),
        "prompt_b1": jnp.zeros((1, mid_dim), jnp.float32),
        "prompt_w2": (s * jax.random.normal(ks[4], (mid_dim, prompt_dim), jnp.float32)
                      ).astype(jnp.bfloat16),
        "prompt_b2": jnp.zeros((1, prompt_dim), jnp.float32),
    }


if __name__ == "__main__":
    B = 2               # batch
    S_VIS = 8           # vision sequence length (CLS + patches)
    VIS_DIM = 128       # vision embed dim
    TEXT_DIM = 256      # OPT hidden size stand-in (2 tn tiles with tn_max=128 exercise)
    L_INJ = 2           # injected_hidden_states (== num_connectors)
    N_HIDDEN = 3        # number of vision hidden states produced
    P_LEN = 8           # prompt_len
    PROMPT_DIM = 128    # word_embed_proj_dim stand-in
    MID_DIM = 128       # mid_dim == prompt_dim in ePALM config

    key = jax.random.PRNGKey(0)
    k_feat, k_par = jax.random.split(key)

    params = init_params(k_par, L=L_INJ, vis_dim=VIS_DIM, text_dim=TEXT_DIM,
                         p_len=P_LEN, prompt_dim=PROMPT_DIM, mid_dim=MID_DIM)

    # Hoisted out of the hot path: batch-invariant prompt table, computed once.
    prompt_cache = precompute_prompt(params)                      # (P_LEN, PROMPT_DIM)

    hidden = jax.random.normal(k_feat, (N_HIDDEN, B, S_VIS, VIS_DIM), jnp.float32)
    image_hidden_states = [hidden[i] for i in range(N_HIDDEN)]

    image_feat, prompts = epalm_forward(image_hidden_states, params, prompt_cache,
                                        injected_hidden_states=L_INJ, bsz=B)
    jax.block_until_ready((image_feat, prompts))

    assert all(f.shape == (B, 1, TEXT_DIM) for f in image_feat)
    assert prompts.shape == (B, P_LEN, PROMPT_DIM)

    # Cross-check against a plain-JAX reference doing the same bf16/f32 math.
    # (bf16 weight storage and bf16 output loosen numerics vs an f32 PyTorch
    #  ePALM; tolerances below reflect bf16 precision.)
    ref_cls = jnp.stack([f[:, 0, :] for f in image_hidden_states[-L_INJ:]],
                        0).astype(jnp.bfloat16)
    ref_proj = (jnp.einsum("lbd,lde->lbe", ref_cls, params["conn_w"],
                           preferred_element_type=jnp.float32)
                + params["conn_b"][:, None, :])
    e = params["prompt_emb"].astype(jnp.bfloat16)
    h = jnp.dot(e, params["prompt_w1"],
                preferred_element_type=jnp.float32) + params["prompt_b1"]
    h = jnp.tanh(h)
    ref_prompt = jnp.dot(h.astype(jnp.bfloat16), params["prompt_w2"],
                         preferred_element_type=jnp.float32) + params["prompt_b2"]

    got_proj = jnp.stack([f[:, 0, :] for f in image_feat], 0).astype(jnp.float32)
    assert jnp.allclose(got_proj, ref_proj, atol=1e-2, rtol=1e-2), \
        float(jnp.max(jnp.abs(got_proj - ref_proj)))
    assert jnp.allclose(prompts[0], ref_prompt, atol=1e-3, rtol=1e-3), \
        float(jnp.max(jnp.abs(prompts[0] - ref_prompt)))

    print("KERNEL_OK")
</pallas_src>

<mosaic_0001>
module attributes {stable_mosaic.version = 11 : i64} {
  func.func @_prompt_mlp_kernel(%arg0: i32, %arg1: memref<16x128xbf16, #tpu.memory_space<vmem>>, %arg2: memref<128x128xbf16, #tpu.memory_space<vmem>>, %arg3: memref<1x128xf32, #tpu.memory_space<vmem>>, %arg4: memref<128x128xbf16, #tpu.memory_space<vmem>>, %arg5: memref<1x128xf32, #tpu.memory_space<vmem>>, %arg6: memref<16x128xf32, #tpu.memory_space<vmem>>) attributes {dimension_semantics = [#tpu.dimension_semantics<arbitrary>], iteration_bounds = array<i64: 1>, scalar_prefetch = 0 : i64, scratch_operands = 0 : i64, tpu.core_type = #tpu.core_type<tc>, window_params = [{pipeline_mode = #tpu.pipeline_mode<synchronous>, transform_indices = @transform_0, window_bounds = array<i64: 16, 128>}, {pipeline_mode = #tpu.pipeline_mode<synchronous>, transform_indices = @transform_1, window_bounds = array<i64: 128, 128>}, {pipeline_mode = #tpu.pipeline_mode<synchronous>, transform_indices = @transform_2, window_bounds = array<i64: 1, 128>}, {pipeline_mode = #tpu.pipeline_mode<synchronous>, transform_indices = @transform_3, window_bounds = array<i64: 128, 128>}, {pipeline_mode = #tpu.pipeline_mode<synchronous>, transform_indices = @transform_4, window_bounds = array<i64: 1, 128>}, {pipeline_mode = #tpu.pipeline_mode<synchronous>, transform_indices = @transform_5, window_bounds = array<i64: 16, 128>}]} {
    %c0 = arith.constant 0 : index
    %c0_0 = arith.constant 0 : index
    %0 = vector.load %arg1[%c0, %c0_0] : memref<16x128xbf16, #tpu.memory_space<vmem>>, vector<16x128xbf16>
    %c0_1 = arith.constant 0 : index
    %c0_2 = arith.constant 0 : index
    %1 = vector.load %arg2[%c0_1, %c0_2] : memref<128x128xbf16, #tpu.memory_space<vmem>>, vector<128x128xbf16>
    %cst = arith.constant dense<0.000000e+00> : vector<16x128xf32>
    %2 = tpu.matmul %0, %1, %cst {dimension_numbers = #tpu.dot_dimension_numbers<[1], [0], [0], [1], [0, 0, 1, 1], [], []>} : vector<16x128xbf16>, vector<128x128xbf16>, vector<16x128xf32> -> vector<16x128xf32>
    %c0_3 = arith.constant 0 : index
    %c0_4 = arith.constant 0 : index
    %3 = vector.load %arg3[%c0_3, %c0_4] : memref<1x128xf32, #tpu.memory_space<vmem>>, vector<1x128xf32>
    %4 = vector.broadcast %3 : vector<1x128xf32> to vector<16x128xf32>
    %5 = arith.addf %2, %4 : vector<16x128xf32>
    %6 = math.tanh %5 : vector<16x128xf32>
    %7 = arith.truncf %6 : vector<16x128xf32> to vector<16x128xbf16>
    %c0_5 = arith.constant 0 : index
    %c0_6 = arith.constant 0 : index
    %8 = vector.load %arg4[%c0_5, %c0_6] : memref<128x128xbf16, #tpu.memory_space<vmem>>, vector<128x128xbf16>
    %cst_7 = arith.constant dense<0.000000e+00> : vector<16x128xf32>
    %9 = tpu.matmul %7, %8, %cst_7 {dimension_numbers = #tpu.dot_dimension_numbers<[1], [0], [0], [1], [0, 0, 1, 1], [], []>} : vector<16x128xbf16>, vector<128x128xbf16>, vector<16x128xf32> -> vector<16x128xf32>
    %c0_8 = arith.constant 0 : index
    %c0_9 = arith.constant 0 : index
    %10 = vector.load %arg5[%c0_8, %c0_9] : memref<1x128xf32, #tpu.memory_space<vmem>>, vector<1x128xf32>
    %11 = vector.broadcast %10 : vector<1x128xf32> to vector<16x128xf32>
    %12 = arith.addf %9, %11 : vector<16x128xf32>
    %c0_10 = arith.constant 0 : index
    %c0_11 = arith.constant 0 : index
    %13 = vector.load %arg6[%c0_10, %c0_11] : memref<16x128xf32, #tpu.memory_space<vmem>>, vector<16x128xf32>
    tpu.vector_store %arg6[%c0_10, %c0_11], %12 {strides = array<i32>} : memref<16x128xf32, #tpu.memory_space<vmem>>, vector<16x128xf32>,
    return
  }
  func.func @transform_0(%arg0: i32) -> (i32, i32) {
    %c0_i32 = arith.constant 0 : i32
    %c0_i32_0 = arith.constant 0 : i32
    %c0_i32_1 = arith.constant 0 : i32
    return %c0_i32, %c0_i32_0 : i32, i32
  }
  func.func @transform_1(%arg0: i32) -> (i32, i32) {
    %c0_i32 = arith.constant 0 : i32
    %c0_i32_0 = arith.constant 0 : i32
    %c0_i32_1 = arith.constant 0 : i32
    return %c0_i32, %c0_i32_0 : i32, i32
  }
  func.func @transform_2(%arg0: i32) -> (i32, i32) {
    %c0_i32 = arith.constant 0 : i32
    %c0_i32_0 = arith.constant 0 : i32
    %c0_i32_1 = arith.constant 0 : i32
    return %c0_i32, %c0_i32_0 : i32, i32
  }
  func.func @transform_3(%arg0: i32) -> (i32, i32) {
    %c0_i32 = arith.constant 0 : i32
    %c0_i32_0 = arith.constant 0 : i32
    %c0_i32_1 = arith.constant 0 : i32
    return %c0_i32, %c0_i32_0 : i32, i32
  }
  func.func @transform_4(%arg0: i32) -> (i32, i32) {
    %c0_i32 = arith.constant 0 : i32
    %c0_i32_0 = arith.constant 0 : i32
    %c0_i32_1 = arith.constant 0 : i32
    return %c0_i32, %c0_i32_0 : i32, i32
  }
  func.func @transform_5(%arg0: i32) -> (i32, i32) {
    %c0_i32 = arith.constant 0 : i32
    %c0_i32_0 = arith.constant 0 : i32
    %c0_i32_1 = arith.constant 0 : i32
    return %c0_i32, %c0_i32_0 : i32, i32
  }
}

</mosaic_0001>

<bundles_post_ra>
// kernel: tpu_custom_call.1
= control target key start
LH: loop header
LB: loop body
LE: loop exit
PB: predicated region body
PF: predicated region fallthrough
CT: control target
= control target key end

     0   :  { %10 = vsyncpa [#allocation3], 0  ;;  %s570_s0 = inlined_call_operand.hbm [shape: bf16[16,128], index: 0, kind: input, shape index: {}]   ;;  %s571_s1 = inlined_call_operand.hbm [shape: bf16[128,128], index: 1, kind: input, shape index: {}]   ;;  %s572_s2 = inlined_call_operand.vmem [shape: f32[1,128], index: 2, kind: input, shape index: {}]   ;;  %s573_s3 = inlined_call_operand.hbm [shape: bf16[128,128], index: 3, kind: input, shape index: {}]   ;;  %s574_s4 = inlined_call_operand.vmem [shape: f32[1,128], index: 4, kind: input, shape index: {}]   ;;  %s575_s5 = inlined_call_operand.hbm [shape: f32[16,128], index: 5, kind: output, shape index: {}]  }
   0x1   :  { %11 = vsyncpa [#allocation6], 0 }
   0x2   :  { %12 = vsyncpa [#allocation4], 0  ;;  %s512_s18 = smov [#allocation5]   ;;  %s513_s20 = smov [#allocation2]  }
   0x3   :  { %s30_s19 = sshll.u32 %s512_s18, 4  ;;  %s18_s21 = sshll.u32 %s513_s20, 4  ;;  %s31_s19 = int_to_ptr.vmem [resolvable:$true] %s30_s19  ;;  %s19_s21 = int_to_ptr.vmem [resolvable:$true] %s18_s21 }
   0x4   :  { %s434_s22 = scalar_lea.vmem %s31_s19, 1024  ;;  %p439_p1 = scmp.lt.s32.totalorder %s31_s19, %s31_s19 }
   0x5   :  { %p435_p0 = scmp.ne.s32.totalorder %s31_s19, %s434_s22  ;;  %p440_p2 = scmp.lt.s32.totalorder %s434_s22, %s434_s22 }
   0x7   :  { %p441_p3 = por %p440_p2, %p439_p1 }
   0x9   :  { %p442_p4 = pnand %p441_p3, %p435_p0 }
   0xb   :  { %445 = shalt.err (!%p442_p4)
}
   0xc   :  { %s514_s23 = smov 64   ;;  %s515_s24 = smov 4  }
   0xd   :  { %36 = dma.hbm_to_vmem [thread:$0]  %s571_s1, 1024, %s31_s19, [#allocation6], %s514_s23, %s514_s23, %s515_s24  }
   0xe   :  { %s454_s27 = scalar_lea.vmem %s19_s21, 128  ;;  %p459_p6 = scmp.lt.s32.totalorder %s19_s21, %s19_s21 }
   0xf   :  { %p455_p5 = scmp.ne.s32.totalorder %s19_s21, %s454_s27  ;;  %p460_p7 = scmp.lt.s32.totalorder %s454_s27, %s454_s27 }
  0x11   :  { %p461_p8 = por %p460_p7, %p459_p6 }
  0x13   :  { %p462_p9 = pnand %p461_p8, %p455_p5 }
  0x15   :  { %465 = shalt.err (!%p462_p9)
}
  0x16   :  { %24 = dma.hbm_to_vmem [thread:$0]  %s570_s0, 128, %s19_s21, [#allocation3], %s514_s23, %s514_s23, %s515_s24  }
  0x17   :  { %s516_s30 = smov [#allocation7]  }
  0x18   :  { %s44_s6 = sshll.u32 %s516_s30, 4  ;;  %s45_s6 = int_to_ptr.vmem [resolvable:$true] %s44_s6 }
  0x19   :  { %s474_s7 = scalar_lea.vmem %s45_s6, 1024  ;;  %p479_p11 = scmp.lt.s32.totalorder %s45_s6, %s45_s6 }
  0x1a   :  { %p475_p10 = scmp.ne.s32.totalorder %s45_s6, %s474_s7  ;;  %p480_p12 = scmp.lt.s32.totalorder %s474_s7, %s474_s7 }
  0x1c   :  { %p481_p13 = por %p480_p12, %p479_p11 }
  0x1e   :  { %p482_p0 = pnand %p481_p13, %p475_p10 }
  0x20   :  { %485 = shalt.err (!%p482_p0)
}
  0x21   :  { %50 = dma.hbm_to_vmem [thread:$0]  %s573_s3, 1024, %s45_s6, [#allocation6], %s514_s23, %s514_s23, %s515_s24  }
  0x22   :  { %506 = dma.done.wait [#allocation3], 128  }
  0x23   :  { %507 = vsyncadd [#allocation3], 4294967168 }
  0x24   :  { %508 = dma.done.wait [#allocation6], 2048  }
  0x25   :  { %509 = vsyncadd [#allocation6], 4294965248  ;;  %v517_v0 = vmov 0.0   ;;  %vm518_vm0 = vmmov 0   ;;  %v405_v1 = vld [vmem:[#allocation5 + $0x38] sm:$0xff]   ;;  %v406_v2 = vld [vmem:[#allocation5 + $0x30] sm:$0xff]  }
  0x26   :  { %355 = vmatprep.subr.bf16.mxu0 %v517_v0  ;;  %371 = vmatprep.mubr.msk.bf16.mxu0 %vm518_vm0, %v517_v0  ;;  %v407_v3 = vld [vmem:[#allocation5 + $0x28] sm:$0xff]   ;;  %v414_v4 = vld [vmem:[#allocation7 + $0x38] sm:$0xff]   ;;  %v408_v5 = vld [vmem:[#allocation5 + $0x20] sm:$0xff]   ;;  %s519_s11 = smov [#allocation8]  }
  0x27   :  { %375 = vmatprep.subr.bf16.mxu1 %v517_v0  ;;  %391 = vmatprep.mubr.msk.bf16.mxu1 %vm518_vm0, %v517_v0  ;;  %v415_v6 = vld [vmem:[#allocation7 + $0x30] sm:$0xff]   ;;  %v409_v7 = vld [vmem:[#allocation5 + $0x18] sm:$0xff]   ;;  %v411_v9 = vld [vmem:[#allocation5 + $0x8] sm:$0xff]  }
  0x28   :  { %356 = vmatpush3.bf16.msra.mxu0 %v405_v1  ;;  %376 = vmatpush3.bf16.msra.mxu1 %v414_v4  ;;  %v410_v8 = vld [vmem:[#allocation5 + $0x10] sm:$0xff]   ;;  %v412_v10 = vld [vmem:[#allocation5] sm:$0xff]   ;;  %v413_v11 = vld [vmem:[#allocation2] sm:$0xff]  }
  0x29   :  { %357 = vmatprep.subr.bf16.mxu0 %v517_v0  ;;  %377 = vmatprep.subr.bf16.mxu1 %v517_v0  ;;  %v416_v12 = vld [vmem:[#allocation7 + $0x28] sm:$0xff]   ;;  %v417_v13 = vld [vmem:[#allocation7 + $0x20] sm:$0xff]   ;;  %v418_v14 = vld [vmem:[#allocation7 + $0x18] sm:$0xff]  }
  0x2a   :  { %v419_v15 = vld [vmem:[#allocation7 + $0x10] sm:$0xff]   ;;  %v420_v16 = vld [vmem:[#allocation7 + $0x8] sm:$0xff]   ;;  %v421_v17 = vld [vmem:[#allocation7] sm:$0xff]  }
  0x2b   :  { %v318_v18 = vld [vmem:[%s572_s2] ss:$0 sm:$0xff]  ;;  %s305_s2 = sshll.u32 %s519_s11, 4  ;;  %s306_s2 = int_to_ptr.vmem [resolvable:$true] %s305_s2 }
  0x2c   :  { %358 = vmatpush3.bf16.msra.mxu0 %v406_v2  ;;  %378 = vmatpush3.bf16.msra.mxu1 %v415_v6  ;;  %v328_v28 = vld [vmem:[%s574_s4] ss:$0 sm:$0xff]  ;;  %s486_s12 = scalar_lea.vmem %s306_s2, 256  ;;  %p491_p2 = scmp.lt.s32.totalorder %s306_s2, %s306_s2 }
  0x2d   :  { %359 = vmatprep.subr.bf16.mxu0 %v517_v0  ;;  %379 = vmatprep.subr.bf16.mxu1 %v517_v0  ;;  %p487_p1 = scmp.ne.s32.totalorder %s306_s2, %s486_s12  ;;  %p492_p3 = scmp.lt.s32.totalorder %s486_s12, %s486_s12 }
  0x2f   :  { %p493_p4 = por %p492_p3, %p491_p2 }
  0x30   :  { %360 = vmatpush3.bf16.msra.mxu0 %v407_v3  ;;  %380 = vmatpush3.bf16.msra.mxu1 %v416_v12 }
  0x31   :  { %361 = vmatprep.subr.bf16.mxu0 %v517_v0  ;;  %381 = vmatprep.subr.bf16.mxu1 %v517_v0  ;;  %p494_p5 = pnand %p493_p4, %p487_p1 }
  0x34   :  { %362 = vmatpush3.bf16.msra.mxu0 %v408_v5  ;;  %382 = vmatpush3.bf16.msra.mxu1 %v417_v13 }
  0x35   :  { %363 = vmatprep.subr.bf16.mxu0 %v517_v0  ;;  %383 = vmatprep.subr.bf16.mxu1 %v517_v0 }
  0x38   :  { %364 = vmatpush3.bf16.msra.mxu0 %v409_v7  ;;  %384 = vmatpush3.bf16.msra.mxu1 %v418_v14 }
  0x39   :  { %365 = vmatprep.subr.bf16.mxu0 %v517_v0  ;;  %385 = vmatprep.subr.bf16.mxu1 %v517_v0 }
  0x3c   :  { %366 = vmatpush3.bf16.msra.mxu0 %v410_v8  ;;  %386 = vmatpush3.bf16.msra.mxu1 %v419_v15 }
  0x3d   :  { %367 = vmatprep.subr.bf16.mxu0 %v517_v0  ;;  %387 = vmatprep.subr.bf16.mxu1 %v517_v0 }
  0x40   :  { %368 = vmatpush3.bf16.msra.mxu0 %v411_v9  ;;  %388 = vmatpush3.bf16.msra.mxu1 %v420_v16 }
  0x41   :  { %369 = vmatprep.subr.bf16.mxu0 %v517_v0  ;;  %389 = vmatprep.subr.bf16.mxu1 %v517_v0 }
  0x44   :  { %370 = vmatpush3.bf16.msra.mxu0 %v412_v10  ;;  %390 = vmatpush3.bf16.msra.mxu1 %v421_v17 }
  0x47   :  { %372 = vmatmul.mubr.bf16.vlgmr.msra.gmra.mxu0 %v413_v11 }
 0x107   :  { %v176_v19 = vpop.f32.mrf.mxu0 }
 0x108   :  { %v177_v20 = vadd.f32 %v318_v18, %v176_v19 }
 0x109   :  { %v373_v21 = vpop.f32.mrf.mxu0 }
 0x10a   :  { %422 = vtanh.f32 %v177_v20 }
 0x10b   :  { %v179_v22 = vpop.f32.mrf.mxu0 }
 0x10c   :  { %v180_v23 = vadd.f32 %v318_v18, %v179_v22 }
 0x10d   :  { %v374_v24 = vpop.f32.mrf.mxu0 }
 0x10e   :  { %424 = vtanh.f32 %v180_v23 }
 0x117   :  { %v423_v25 = vpop.eup %422 }
 0x11b   :  { %v425_v26 = vpop.eup %424 }
 0x11c   :  { %v185_v27 = vpack.c.bf16 %v425_v26, %v423_v25 }
 0x11e   :  { %392 = vmatmul.mubr.bf16.vlgmr.msra.gmra.mxu1 %v185_v27 }
 0x1de   :  { %v291_v29 = vpop.f32.mrf.mxu1 }
 0x1df   :  { %v292_v30 = vadd.f32 %v328_v28, %v291_v29 }
 0x1e0   :  { %v393_v31 = vpop.f32.mrf.mxu1 }
 0x1e1   :  { %298 = vst [vmem:[#allocation8] sm:$0xff] %v292_v30 }
 0x1e2   :  { %v294_v32 = vpop.f32.mrf.mxu1 }
 0x1e3   :  { %v295_v33 = vadd.f32 %v328_v28, %v294_v32 }
 0x1e4   :  { %v394_v34 = vpop.f32.mrf.mxu1 }
 0x1e5   :  { %299 = vst [vmem:[#allocation8 + $0x8] sm:$0xff] %v295_v33 }
 0x1e6   :  { %497 = shalt.err (!%p494_p5)
}
 0x1e7   :  { %s520_s13 = smov 128   ;;  %s521_s4 = smov 8  }
 0x1e8   :  { %311 = dma.vmem_to_hbm [thread:$0]  %s306_s2, 256, %s575_s5, [#allocation4], %s520_s13, %s520_s13, %s521_s4  }
 0x1e9   :  { %510 = dma.done.wait [#allocation4], 256  }
 0x1ea   :  { %511 = vsyncadd [#allocation4], 4294967040 }
 0x1eb   :  { %315 = vsyncpa [#allocation3], 1 }
 0x1ec   :  { %316 = vsyncpa [#allocation6], 1 }
 0x1ed   :  { %317 = vsyncpa [#allocation4], 1 }

</bundles_post_ra>
